<compile_context>
chip_gen: v7x
topology: tpu7x:2x2x1
jax: 0.10.0
libtpu: 0.0.40
codegen_flags: <defaults>
</compile_context>

<pallas_src>
import functools
import math

import jax
import jax.numpy as jnp
from jax.experimental import pallas as pl
from jax.experimental.pallas import tpu as pltpu


# ----------------------------------------------------------------------------
# Kernel
# ----------------------------------------------------------------------------
def _random_layer_kernel(x0_ref, w0_ref, x1_ref, w1_ref, o_ref, *, scale,
                         compute_dtype):
    # Activations arrive in their original dtype (f32); cast in-kernel to the
    # weight compute dtype (bf16) so both dots take the native MXU path.
    x0 = x0_ref[...].astype(compute_dtype)
    x1 = x1_ref[...].astype(compute_dtype)
    # Both contractions on the MXU with f32 accumulation.
    y0 = jnp.dot(x0, w0_ref[...], preferred_element_type=jnp.float32)
    y1 = jnp.dot(x1, w1_ref[...], preferred_element_type=jnp.float32)
    # Single scale applied to the final product (== scaling y0, one VPU mul).
    o_ref[...] = (y0 * y1 * scale).astype(o_ref.dtype)


# ----------------------------------------------------------------------------
# Tiling helpers (generation-aware VMEM budget)
# ----------------------------------------------------------------------------
def _detect_vmem_capacity_bytes():
    try:
        info = pltpu.get_tpu_info()
        cap = getattr(info, "vmem_capacity_bytes", None)
        if cap:
            return int(cap)
    except Exception:
        pass
    return 64 * 1024 * 1024  # conservative fallback (v7x per-TC VMEM)


def _default_vmem_budget(capacity_bytes):
    if capacity_bytes >= 128 * 1024 * 1024:
        # v5e / v6e: 128 MiB physical VMEM -> big budget keeps tn full width.
        return 96 * 1024 * 1024
    # v7x (64 MiB per TC) or unknown: stay well under physical to leave room
    # for Mosaic internal scratch and avoid spills.
    return min(int(capacity_bytes * 0.70), 48 * 1024 * 1024)


def _vmem_working_set_bytes(tb, k0, k1, tn, w_isz, x_isz, o_isz):
    # Double-buffered pipeline inputs/outputs + the two f32 dot intermediates
    # (y0, y1) which are live simultaneously with the output tile.
    x_bytes = tb * (k0 + k1) * x_isz
    w_bytes = (k0 + k1) * tn * w_isz
    o_bytes = tb * tn * o_isz
    intermediates = 2 * tb * tn * 4
    return 2 * (x_bytes + w_bytes + o_bytes) + intermediates


def _pick_col_tile(n, tb, k0, k1, w_isz, x_isz, o_isz, budget_bytes):
    """Prefer a single full-width (lane-dense) tile; otherwise the largest
    multiple of 128 that fits the budget (tail handled by a cdiv grid)."""
    if _vmem_working_set_bytes(tb, k0, k1, n, w_isz, x_isz, o_isz) <= budget_bytes:
        return n
    per_col = 2 * ((k0 + k1) * w_isz + tb * o_isz) + 2 * tb * 4
    fixed = 2 * tb * (k0 + k1) * x_isz
    t = (budget_bytes - fixed) // max(per_col, 1)
    t = (t // 128) * 128
    n_floor = max((n // 128) * 128, 128)
    return int(max(128, min(t, n_floor)))


def _pick_batch_tile(b):
    return b if b <= 256 else 256


# ----------------------------------------------------------------------------
# Module init / forward
# ----------------------------------------------------------------------------
def init_random_layer(key, input_dim_list, output_dim=1024,
                      param_dtype=jnp.bfloat16):
    """torch.randn-equivalent random matrices, cast ONCE to the compute dtype
    so the forward pass never re-converts them."""
    keys = jax.random.split(key, max(len(input_dim_list), 1))
    return tuple(
        jax.random.normal(k, (d, output_dim), dtype=jnp.float32).astype(param_dtype)
        for k, d in zip(keys, input_dim_list))


def random_layer_forward(input_list, random_matrix, *,
                         out_dtype=jnp.float32,
                         vmem_budget_bytes=None):
    """Fused RandomLayer forward for input_num == 2."""
    assert len(input_list) == 2 and len(random_matrix) == 2, \
        "kernel covers the canonical 2-input case"
    x0, x1 = input_list
    w0, w1 = random_matrix

    B, K0 = x0.shape
    K1 = x1.shape[1]
    N = w0.shape[1]
    assert x1.shape[0] == B and w0.shape[0] == K0 and w1.shape == (K1, N)

    output_dim = N
    n_inputs = 2
    scale = 1.0 / math.pow(float(output_dim), 1.0 / n_inputs)

    compute_dtype = w0.dtype            # weights pre-cast at init (bf16)
    w_isz = jnp.dtype(compute_dtype).itemsize
    x_isz = jnp.dtype(x0.dtype).itemsize
    o_isz = jnp.dtype(out_dtype).itemsize

    if vmem_budget_bytes is None:
        vmem_budget_bytes = _default_vmem_budget(_detect_vmem_capacity_bytes())

    tb = _pick_batch_tile(B)
    tn = _pick_col_tile(N, tb, K0, K1, w_isz, x_isz, o_isz, vmem_budget_bytes)

    # N-axis first (sharded across TensorCores), batch innermost so a weight
    # column tile stays resident across batch steps.
    grid = (pl.cdiv(N, tn), pl.cdiv(B, tb))

    kernel = functools.partial(_random_layer_kernel, scale=scale,
                               compute_dtype=compute_dtype)

    flops = 2 * B * (K0 + K1) * N
    bytes_accessed = ((x0.size + x1.size) * x_isz
                      + (w0.size + w1.size) * w_isz
                      + B * N * o_isz)
    cost = pl.CostEstimate(flops=flops, transcendentals=0,
                           bytes_accessed=bytes_accessed)

    # Always set: N axis parallel (disjoint weight halves per core on v7x),
    # batch axis arbitrary (keeps the weight tile resident, never split).
    # vmem_limit_bytes matches the budget the tile picker used.
    compiler_params = pltpu.CompilerParams(
        dimension_semantics=("parallel", "arbitrary"),
        vmem_limit_bytes=int(vmem_budget_bytes),
    )

    return pl.pallas_call(
        kernel,
        out_shape=jax.ShapeDtypeStruct((B, N), out_dtype),
        grid_spec=pltpu.PrefetchScalarGridSpec(
            num_scalar_prefetch=0,
            grid=grid,
            in_specs=[
                pl.BlockSpec((tb, K0), lambda j, b: (b, 0)),   # x0 row block
                pl.BlockSpec((K0, tn), lambda j, b: (0, j)),   # w0 column tile
                pl.BlockSpec((tb, K1), lambda j, b: (b, 0)),   # x1 row block
                pl.BlockSpec((K1, tn), lambda j, b: (0, j)),   # w1 column tile
            ],
            out_specs=pl.BlockSpec((tb, tn), lambda j, b: (b, j)),
        ),
        compiler_params=compiler_params,
        cost_estimate=cost,
    )(x0, w0, x1, w1)


def random_layer_reference(input_list, random_matrices, output_dim):
    """Pure-JAX reference mirroring the PyTorch forward (f32 accumulation)."""
    outs = [jnp.dot(x, w, preferred_element_type=jnp.float32)
            for x, w in zip(input_list, random_matrices)]
    ret = outs[0] / math.pow(float(output_dim), 1.0 / len(outs))
    for single in outs[1:]:
        ret = ret * single
    return ret


if __name__ == "__main__":
    # Small shapes consistent with the module: two inputs (features + softmax
    # logits in DANN-style usage), default output_dim=1024.
    B = 8
    input_dim_list = [32, 64]
    output_dim = 1024

    key = jax.random.PRNGKey(0)
    k_params, k_x0, k_x1 = jax.random.split(key, 3)

    # Random matrices created and cast to bf16 once (module init).
    random_matrix = init_random_layer(k_params, input_dim_list, output_dim)

    x0 = jax.random.normal(k_x0, (B, input_dim_list[0]), dtype=jnp.float32)
    x1 = jax.random.normal(k_x1, (B, input_dim_list[1]), dtype=jnp.float32)

    out = random_layer_forward([x0, x1], random_matrix)
    out = jax.block_until_ready(out)

    # Reference computed at matching precision (bf16 operands, f32 accumulation)
    # so the check validates fusion/indexing, not bf16 rounding of the random
    # projection.
    ref = random_layer_reference(
        [x0.astype(jnp.bfloat16), x1.astype(jnp.bfloat16)],
        random_matrix,
        output_dim,
    )

    assert out.shape == (B, output_dim)
    assert bool(jnp.all(jnp.isfinite(out))), "non-finite output"
    assert jnp.allclose(out, ref, rtol=1e-4, atol=1e-3), "mismatch vs reference"

    print("KERNEL_OK")
</pallas_src>

<mosaic_0001>
module attributes {stable_mosaic.version = 11 : i64} {
  func.func @_random_layer_kernel(%arg0: i32, %arg1: i32, %arg2: memref<8x32xf32, #tpu.memory_space<vmem>>, %arg3: memref<32x1024xbf16, #tpu.memory_space<vmem>>, %arg4: memref<8x64xf32, #tpu.memory_space<vmem>>, %arg5: memref<64x1024xbf16, #tpu.memory_space<vmem>>, %arg6: memref<8x1024xf32, #tpu.memory_space<vmem>>) attributes {dimension_semantics = [#tpu.dimension_semantics<parallel>, #tpu.dimension_semantics<arbitrary>], iteration_bounds = array<i64: 1, 1>, scalar_prefetch = 0 : i64, scratch_operands = 0 : i64, tpu.core_type = #tpu.core_type<tc>, window_params = [{transform_indices = @transform_0, window_bounds = array<i64: 8, 32>}, {transform_indices = @transform_1, window_bounds = array<i64: 32, 1024>}, {transform_indices = @transform_2, window_bounds = array<i64: 8, 64>}, {transform_indices = @transform_3, window_bounds = array<i64: 64, 1024>}, {transform_indices = @transform_4, window_bounds = array<i64: 8, 1024>}]} {
    %c0 = arith.constant 0 : index
    %c0_0 = arith.constant 0 : index
    %0 = vector.load %arg2[%c0, %c0_0] : memref<8x32xf32, #tpu.memory_space<vmem>>, vector<8x32xf32>
    %1 = arith.truncf %0 : vector<8x32xf32> to vector<8x32xbf16>
    %c0_1 = arith.constant 0 : index
    %c0_2 = arith.constant 0 : index
    %2 = vector.load %arg4[%c0_1, %c0_2] : memref<8x64xf32, #tpu.memory_space<vmem>>, vector<8x64xf32>
    %3 = arith.truncf %2 : vector<8x64xf32> to vector<8x64xbf16>
    %c0_3 = arith.constant 0 : index
    %c0_4 = arith.constant 0 : index
    %4 = vector.load %arg3[%c0_3, %c0_4] : memref<32x1024xbf16, #tpu.memory_space<vmem>>, vector<32x1024xbf16>
    %cst = arith.constant dense<0.000000e+00> : vector<8x1024xf32>
    %5 = tpu.matmul %1, %4, %cst {dimension_numbers = #tpu.dot_dimension_numbers<[1], [0], [0], [1], [0, 0, 1, 1], [], []>} : vector<8x32xbf16>, vector<32x1024xbf16>, vector<8x1024xf32> -> vector<8x1024xf32>
    %c0_5 = arith.constant 0 : index
    %c0_6 = arith.constant 0 : index
    %6 = vector.load %arg5[%c0_5, %c0_6] : memref<64x1024xbf16, #tpu.memory_space<vmem>>, vector<64x1024xbf16>
    %cst_7 = arith.constant dense<0.000000e+00> : vector<8x1024xf32>
    %7 = tpu.matmul %3, %6, %cst_7 {dimension_numbers = #tpu.dot_dimension_numbers<[1], [0], [0], [1], [0, 0, 1, 1], [], []>} : vector<8x64xbf16>, vector<64x1024xbf16>, vector<8x1024xf32> -> vector<8x1024xf32>
    %8 = arith.mulf %5, %7 : vector<8x1024xf32>
    %cst_8 = arith.constant 3.125000e-02 : f32
    %9 = vector.broadcast %cst_8 : f32 to vector<8x1024xf32>
    %10 = arith.mulf %8, %9 : vector<8x1024xf32>
    %c0_9 = arith.constant 0 : index
    %c0_10 = arith.constant 0 : index
    %11 = vector.load %arg6[%c0_9, %c0_10] : memref<8x1024xf32, #tpu.memory_space<vmem>>, vector<8x1024xf32>
    tpu.vector_store %arg6[%c0_9, %c0_10], %10 {strides = array<i32>} : memref<8x1024xf32, #tpu.memory_space<vmem>>, vector<8x1024xf32>,
    return
  }
  func.func @transform_0(%arg0: i32, %arg1: i32) -> (i32, i32) {
    %c0_i32 = arith.constant 0 : i32
    %c0_i32_0 = arith.constant 0 : i32
    return %arg1, %c0_i32 : i32, i32
  }
  func.func @transform_1(%arg0: i32, %arg1: i32) -> (i32, i32) {
    %c0_i32 = arith.constant 0 : i32
    %c0_i32_0 = arith.constant 0 : i32
    return %c0_i32, %arg0 : i32, i32
  }
  func.func @transform_2(%arg0: i32, %arg1: i32) -> (i32, i32) {
    %c0_i32 = arith.constant 0 : i32
    %c0_i32_0 = arith.constant 0 : i32
    return %arg1, %c0_i32 : i32, i32
  }
  func.func @transform_3(%arg0: i32, %arg1: i32) -> (i32, i32) {
    %c0_i32 = arith.constant 0 : i32
    %c0_i32_0 = arith.constant 0 : i32
    return %c0_i32, %arg0 : i32, i32
  }
  func.func @transform_4(%arg0: i32, %arg1: i32) -> (i32, i32) {
    %c0_i32 = arith.constant 0 : i32
    return %arg1, %arg0 : i32, i32
  }
}

</mosaic_0001>

<bundles_post_ra>
// kernel: tpu_custom_call.1
= control target key start
LH: loop header
LB: loop body
LE: loop exit
PB: predicated region body
PF: predicated region fallthrough
CT: control target
= control target key end

     0   :  { %9 = vsyncpa [#allocation3], 0  ;;  %s1036_s0 = inlined_call_operand.hbm [shape: f32[8,32], index: 0, kind: input, shape index: {}]   ;;  %s1037_s1 = inlined_call_operand.hbm [shape: bf16[32,1024], index: 1, kind: input, shape index: {}]   ;;  %s1038_s2 = inlined_call_operand.hbm [shape: f32[8,64], index: 2, kind: input, shape index: {}]   ;;  %s1039_s3 = inlined_call_operand.hbm [shape: bf16[64,1024], index: 3, kind: input, shape index: {}]   ;;  %s1040_s4 = inlined_call_operand.hbm [shape: f32[8,1024], index: 4, kind: output, shape index: {}]  }
   0x1   :  { %10 = vsyncpa [#allocation6], 0 }
   0x2   :  { %11 = vsyncpa [#allocation9], 0 }
   0x3   :  { %12 = vsyncpa [#allocation4], 0  ;;  %s921_s15 = smov [#allocation5]   ;;  %s803_s19 = scalar_lea.hbm %s1037_s1, 2048 }
   0x4   :  { %s28_s16 = sshll.u32 %s921_s15, 4  ;;  %p804_p0 = scmp.ne.s32.totalorder %s1037_s1, %s803_s19  ;;  %s29_s16 = int_to_ptr.vmem [resolvable:$true] %s28_s16 }
   0x5   :  { %p807_p1 = scmp.lt.u32.totalorder %s803_s19, %s1037_s1 }
   0x7   :  { %p809_p2 = pnand %p807_p1, %p804_p0 }
   0x9   :  { %812 = shalt.err (!%p809_p2)
}
   0xa   :  { %s813_s24 = scalar_lea.vmem %s29_s16, 2048  ;;  %p818_p4 = scmp.lt.s32.totalorder %s29_s16, %s29_s16 }
   0xb   :  { %p814_p3 = scmp.ne.s32.totalorder %s29_s16, %s813_s24  ;;  %p819_p5 = scmp.lt.s32.totalorder %s813_s24, %s813_s24 }
   0xd   :  { %p820_p6 = por %p819_p5, %p818_p4 }
   0xf   :  { %p821_p7 = pnand %p820_p6, %p814_p3 }
  0x11   :  { %824 = shalt.err (!%p821_p7)
}
  0x12   :  { %s922_s25 = smov 512   ;;  %s923_s26 = smov 32  }
  0x13   :  { %34 = dma.hbm_to_vmem [thread:$0]  %s1037_s1, 2048, %s29_s16, [#allocation6], %s922_s25, %s922_s25, %s923_s26  }
  0x14   :  { %s924_s29 = smov [#allocation2]   ;;  %s925_s5 = smov [#allocation7]  }
  0x15   :  { %s19_s30 = sshll.u32 %s924_s29, 4  ;;  %s41_s6 = sshll.u32 %s925_s5, 4  ;;  %s20_s30 = int_to_ptr.vmem [resolvable:$true] %s19_s30  ;;  %s42_s6 = int_to_ptr.vmem [resolvable:$true] %s41_s6 }
  0x16   :  { %s825_s9 = scalar_lea.hbm %s1036_s0, 128 }
  0x17   :  { %p826_p8 = scmp.ne.s32.totalorder %s1036_s0, %s825_s9  ;;  %p829_p9 = scmp.lt.u32.totalorder %s825_s9, %s1036_s0 }
  0x19   :  { %p831_p10 = pnand %p829_p9, %p826_p8 }
  0x1b   :  { %834 = shalt.err (!%p831_p10)
}
  0x1c   :  { %s835_s1 = scalar_lea.vmem %s20_s30, 128  ;;  %p840_p12 = scmp.lt.s32.totalorder %s20_s30, %s20_s30 }
  0x1d   :  { %p836_p11 = scmp.ne.s32.totalorder %s20_s30, %s835_s1  ;;  %p841_p13 = scmp.lt.s32.totalorder %s835_s1, %s835_s1 }
  0x1f   :  { %p842_p0 = por %p841_p13, %p840_p12 }
  0x21   :  { %p843_p1 = pnand %p842_p0, %p836_p11 }
  0x23   :  { %846 = shalt.err (!%p843_p1)
}
  0x24   :  { %22 = dma.hbm_to_vmem [thread:$0]  %s1036_s0, 128, %s20_s30, [#allocation3]  }
  0x25   :  { %s847_s18 = scalar_lea.hbm %s1038_s2, 128 }
  0x26   :  { %p848_p2 = scmp.ne.s32.totalorder %s1038_s2, %s847_s18  ;;  %p851_p3 = scmp.lt.u32.totalorder %s847_s18, %s1038_s2 }
  0x28   :  { %p853_p4 = pnand %p851_p3, %p848_p2 }
  0x2a   :  { %856 = shalt.err (!%p853_p4)
}
  0x2b   :  { %s857_s23 = scalar_lea.vmem %s42_s6, 128  ;;  %p862_p6 = scmp.lt.s32.totalorder %s42_s6, %s42_s6 }
  0x2c   :  { %p858_p5 = scmp.ne.s32.totalorder %s42_s6, %s857_s23  ;;  %p863_p7 = scmp.lt.s32.totalorder %s857_s23, %s857_s23 }
  0x2e   :  { %p864_p8 = por %p863_p7, %p862_p6 }
  0x30   :  { %p865_p9 = pnand %p864_p8, %p858_p5 }
  0x32   :  { %868 = shalt.err (!%p865_p9)
}
  0x33   :  { %44 = dma.hbm_to_vmem [thread:$0]  %s1038_s2, 128, %s42_s6, [#allocation6]  }
  0x34   :  { %s926_s27 = smov [#allocation8]   ;;  %s869_s5 = scalar_lea.hbm %s1039_s3, 4096 }
  0x35   :  { %s50_s28 = sshll.u32 %s926_s27, 4  ;;  %p870_p10 = scmp.ne.s32.totalorder %s1039_s3, %s869_s5  ;;  %s51_s28 = int_to_ptr.vmem [resolvable:$true] %s50_s28 }
  0x36   :  { %p873_p11 = scmp.lt.u32.totalorder %s869_s5, %s1039_s3 }
  0x38   :  { %p875_p12 = pnand %p873_p11, %p870_p10 }
  0x3a   :  { %878 = shalt.err (!%p875_p12)
}
  0x3b   :  { %s879_s11 = scalar_lea.vmem %s51_s28, 4096  ;;  %p884_p0 = scmp.lt.s32.totalorder %s51_s28, %s51_s28 }
  0x3c   :  { %p880_p13 = scmp.ne.s32.totalorder %s51_s28, %s879_s11  ;;  %p885_p1 = scmp.lt.s32.totalorder %s879_s11, %s879_s11 }
  0x3e   :  { %p886_p2 = por %p885_p1, %p884_p0 }
  0x40   :  { %p887_p3 = pnand %p886_p2, %p880_p13 }
  0x42   :  { %890 = shalt.err (!%p887_p3)
}
  0x43   :  { %56 = dma.hbm_to_vmem [thread:$0]  %s1039_s3, 4096, %s51_s28, [#allocation9], %s922_s25, %s922_s25, %s923_s26  }
  0x44   :  { %913 = dma.done.wait [#allocation3], 128  }
  0x45   :  { %914 = vsyncadd [#allocation3], 4294967168 }
  0x46   :  { %915 = dma.done.wait [#allocation6], 2176  }
  0x47   :  { %916 = vsyncadd [#allocation6], 4294965120 }
  0x48   :  { %917 = dma.done.wait [#allocation9], 4096  }
  0x49   :  { %918 = vsyncadd [#allocation9], 4294963200  ;;  %v927_v0 = vmov 0   ;;  %v74_v1 = vld [vmem:[#allocation5] sm:$0xff]  ;;  %v75_v3 = vld [vmem:[#allocation5 + $0x8] sm:$0xff]  ;;  %vm170_vm0 = vcmask 261120  }
  0x4a   :  { %206 = vmatprep.mubr.bf16.mxu0 %v927_v0  ;;  %247 = vmatprep.mubr.bf16.mxu1 %v927_v0  ;;  %v78_v2 = vld [vmem:[#allocation5 + $0x20] sm:$0xff]  ;;  %v79_v5 = vld [vmem:[#allocation5 + $0x28] sm:$0xff]  ;;  %v76_v15 = vld [vmem:[#allocation5 + $0x10] sm:$0xff]  ;;  %vm530_vm1 = vcmask 523264   ;;  %s928_s3 = smov [#allocation10]  }
  0x4b   :  { %v740_v4 = vcombine.high %v74_v1, %v78_v2  ;;  %v739_v6 = vcombine.low %v74_v1, %v78_v2  ;;  %v82_v7 = vld [vmem:[#allocation5 + $0x40] sm:$0xff]  ;;  %v742_v9 = vcombine.high %v75_v3, %v79_v5  ;;  %v741_v10 = vcombine.low %v75_v3, %v79_v5  ;;  %v83_v12 = vld [vmem:[#allocation5 + $0x48] sm:$0xff]  ;;  %v80_v16 = vld [vmem:[#allocation5 + $0x30] sm:$0xff]  ;;  %s728_s25 = sshll.u32 %s928_s3, 4  ;;  %s729_s25 = int_to_ptr.vmem [resolvable:$true] %s728_s25 }
  0x4c   :  { %v86_v8 = vld [vmem:[#allocation5 + $0x60] sm:$0xff]  ;;  %v87_v13 = vld [vmem:[#allocation5 + $0x68] sm:$0xff]  ;;  %v77_v17 = vld [vmem:[#allocation5 + $0x18] sm:$0xff]  ;;  %v744_v22 = vcombine.high %v76_v15, %v80_v16  ;;  %v743_v29 = vcombine.low %v76_v15, %v80_v16  ;;  %s891_s26 = scalar_lea.vmem %s729_s25, 1024  ;;  %p896_p5 = scmp.lt.s32.totalorder %s729_s25, %s729_s25 }
  0x4d   :  { %v748_v11 = vcombine.high %v82_v7, %v86_v8  ;;  %174 = vmatprep.subr.bf16.mxu0 %v740_v4  ;;  %v750_v14 = vcombine.high %v83_v12, %v87_v13  ;;  %215 = vmatprep.subr.bf16.mxu1 %v742_v9  ;;  %v747_v18 = vcombine.low %v82_v7, %v86_v8  ;;  %v70_v19 = vld [vmem:[#allocation2] sm:$0xff]  ;;  %v84_v24 = vld [vmem:[#allocation5 + $0x50] sm:$0xff]  ;;  %v338_v33 = vld [vmem:[#allocation8] sm:$0xff]  ;;  %p892_p4 = scmp.ne.s32.totalorder %s729_s25, %s891_s26  ;;  %p897_p6 = scmp.lt.s32.totalorder %s891_s26, %s891_s26 }
  0x4e   :  { %175 = vmatpush1.bf16.msra.mxu0 %v739_v6  ;;  %v81_v20 = vld [vmem:[#allocation5 + $0x38] sm:$0xff]  ;;  %216 = vmatpush1.bf16.msra.mxu1 %v741_v10  ;;  %v749_v21 = vcombine.low %v83_v12, %v87_v13  ;;  %v88_v25 = vld [vmem:[#allocation5 + $0x70] sm:$0xff]  ;;  %v71_v26 = vpack.c.bf16 %v70_v19, %v70_v19  ;;  %v342_v34 = vld [vmem:[#allocation8 + $0x20] sm:$0xff] }
  0x4f   :  { %176 = vmatprep.subr.bf16.mxu0 %v748_v11  ;;  %217 = vmatprep.subr.bf16.mxu1 %v750_v14  ;;  %v746_v23 = vcombine.high %v77_v17, %v81_v20  ;;  %v85_v27 = vld [vmem:[#allocation5 + $0x58] sm:$0xff]  ;;  %v745_v30 = vcombine.low %v77_v17, %v81_v20  ;;  %v752_v31 = vcombine.high %v84_v24, %v88_v25  ;;  %v339_v35 = vld [vmem:[#allocation8 + $0x8] sm:$0xff]  ;;  %v346_v41 = vld [vmem:[#allocation8 + $0x40] sm:$0xff]  ;;  %p898_p7 = por %p897_p6, %p896_p5 }
  0x50   :  { %v89_v28 = vld [vmem:[#allocation5 + $0x78] sm:$0xff]  ;;  %v343_v36 = vld [vmem:[#allocation8 + $0x28] sm:$0xff]  ;;  %v751_v37 = vcombine.low %v84_v24, %v88_v25  ;;  %v760_v39 = vcombine.high %v338_v33, %v342_v34  ;;  %v350_v42 = vld [vmem:[#allocation8 + $0x60] sm:$0xff]  ;;  %v759_v45 = vcombine.low %v338_v33, %v342_v34 }
  0x51   :  { %v754_v32 = vcombine.high %v85_v27, %v89_v28  ;;  %v753_v38 = vcombine.low %v85_v27, %v89_v28  ;;  %v762_v40 = vcombine.high %v339_v35, %v343_v36  ;;  %v347_v43 = vld [vmem:[#allocation8 + $0x48] sm:$0xff]  ;;  %v761_v46 = vcombine.low %v339_v35, %v343_v36  ;;  %v354_v49 = vld [vmem:[#allocation8 + $0x80] sm:$0xff]  ;;  %v340_v2 = vld [vmem:[#allocation8 + $0x10] sm:$0xff]  ;;  %p899_p8 = pnand %p898_p7, %p892_p4 }
  0x52   :  { %177 = vmatpush1.bf16.msra.mxu0 %v747_v18  ;;  %218 = vmatpush1.bf16.msra.mxu1 %v749_v21  ;;  %v351_v44 = vld [vmem:[#allocation8 + $0x68] sm:$0xff]  ;;  %v768_v47 = vcombine.high %v346_v41, %v350_v42  ;;  %v358_v50 = vld [vmem:[#allocation8 + $0xa0] sm:$0xff]  ;;  %v767_v53 = vcombine.low %v346_v41, %v350_v42  ;;  %v344_v3 = vld [vmem:[#allocation8 + $0x30] sm:$0xff] }
  0x53   :  { %256 = vmatprep.subr.bf16.mxu0 %v744_v22  ;;  %297 = vmatprep.subr.bf16.mxu1 %v746_v23  ;;  %v770_v48 = vcombine.high %v347_v43, %v351_v44  ;;  %v355_v51 = vld [vmem:[#allocation8 + $0x88] sm:$0xff]  ;;  %v769_v54 = vcombine.low %v347_v43, %v351_v44  ;;  %v776_v55 = vcombine.high %v354_v49, %v358_v50  ;;  %v362_v57 = vld [vmem:[#allocation8 + $0xc0] sm:$0xff]  ;;  %v341_v4 = vld [vmem:[#allocation8 + $0x18] sm:$0xff] }
  0x54   :  { %v359_v52 = vld [vmem:[#allocation8 + $0xa8] sm:$0xff]  ;;  %v366_v58 = vld [vmem:[#allocation8 + $0xe0] sm:$0xff]  ;;  %v775_v61 = vcombine.low %v354_v49, %v358_v50  ;;  %v345_v5 = vld [vmem:[#allocation8 + $0x38] sm:$0xff]  ;;  %v764_v9 = vcombine.high %v340_v2, %v344_v3  ;;  %v763_v16 = vcombine.low %v340_v2, %v344_v3 }
  0x55   :  { %755 = vmatmul.mubr.msk.bf16.vlgmr.msra.gmra.mrb[0].mxu0 %vm170_vm0, %v71_v26  ;;  %756 = vmatmul.mubr.msk.bf16.vlgmr.msra.gmra.mrb[0].mxu1 %vm170_vm0, %v71_v26  ;;  %v778_v56 = vcombine.high %v355_v51, %v359_v52  ;;  %v363_v59 = vld [vmem:[#allocation8 + $0xc8] sm:$0xff]  ;;  %v777_v62 = vcombine.low %v355_v51, %v359_v52  ;;  %v784_v63 = vcombine.high %v362_v57, %v366_v58  ;;  %v72_v7 = vld [vmem:[#allocation7] sm:$0xff]  ;;  %v348_v11 = vld [vmem:[#allocation8 + $0x50] sm:$0xff] }
  0x56   :  { %257 = vmatpush1.bf16.msra.mxu0 %v743_v29  ;;  %298 = vmatpush1.bf16.msra.mxu1 %v745_v30  ;;  %v367_v60 = vld [vmem:[#allocation8 + $0xe8] sm:$0xff]  ;;  %v783_v6 = vcombine.low %v362_v57, %v366_v58  ;;  %v766_v10 = vcombine.high %v341_v4, %v345_v5  ;;  %v352_v12 = vld [vmem:[#allocation8 + $0x70] sm:$0xff]  ;;  %v73_v13 = vpack.c.bf16 %v72_v7, %v72_v7  ;;  %v349_v14 = vld [vmem:[#allocation8 + $0x58] sm:$0xff] }
  0x57   :  { %258 = vmatprep.subr.bf16.mxu0 %v752_v31  ;;  %299 = vmatprep.subr.bf16.mxu1 %v754_v32  ;;  %v786_v1 = vcombine.high %v363_v59, %v367_v60  ;;  %v785_v8 = vcombine.low %v363_v59, %v367_v60  ;;  %v353_v15 = vld [vmem:[#allocation8 + $0x78] sm:$0xff]  ;;  %v765_v17 = vcombine.low %v341_v4, %v345_v5  ;;  %v356_v20 = vld [vmem:[#allocation8 + $0x90] sm:$0xff] }
  0x58   :  { %288 = vmatprep.mubr.bf16.mxu0 %v927_v0  ;;  %329 = vmatprep.mubr.bf16.mxu1 %v927_v0  ;;  %v772_v18 = vcombine.high %v348_v11, %v352_v12  ;;  %v774_v19 = vcombine.high %v349_v14, %v353_v15  ;;  %v360_v21 = vld [vmem:[#allocation8 + $0xb0] sm:$0xff]  ;;  %v357_v22 = vld [vmem:[#allocation8 + $0x98] sm:$0xff]  ;;  %v771_v24 = vcombine.low %v348_v11, %v352_v12 }
  0x59   :  { %v361_v23 = vld [vmem:[#allocation8 + $0xb8] sm:$0xff]  ;;  %v773_v25 = vcombine.low %v349_v14, %v353_v15  ;;  %v364_v28 = vld [vmem:[#allocation8 + $0xd0] sm:$0xff]  ;;  %v779_v32 = vcombine.low %v356_v20, %v360_v21 }
  0x5a   :  { %259 = vmatpush1.bf16.msra.mxu0 %v751_v37  ;;  %300 = vmatpush1.bf16.msra.mxu1 %v753_v38  ;;  %v782_v27 = vcombine.high %v357_v22, %v361_v23  ;;  %v368_v29 = vld [vmem:[#allocation8 + $0xf0] sm:$0xff]  ;;  %v365_v30 = vld [vmem:[#allocation8 + $0xd8] sm:$0xff]  ;;  %v781_v33 = vcombine.low %v357_v22, %v361_v23 }
  0x5b   :  { %534 = vmatprep.subr.bf16.mxu0 %v760_v39  ;;  %575 = vmatprep.subr.bf16.mxu1 %v762_v40  ;;  %v369_v31 = vld [vmem:[#allocation8 + $0xf8] sm:$0xff]  ;;  %v788_v34 = vcombine.high %v364_v28, %v368_v29  ;;  %v787_v36 = vcombine.low %v364_v28, %v368_v29 }
  0x5c   :  { %v790_v35 = vcombine.high %v365_v30, %v369_v31  ;;  %v789_v37 = vcombine.low %v365_v30, %v369_v31 }
  0x5d   :  { %757 = vmatmul.mubr.msk.bf16.vlgmr.msra.gmra.mrb[4].mxu0 %vm170_vm0, %v71_v26  ;;  %758 = vmatmul.mubr.msk.bf16.vlgmr.msra.gmra.mrb[4].mxu1 %vm170_vm0, %v71_v26  ;;  %v780_v26 = vcombine.high %v356_v20, %v360_v21 }
  0x5e   :  { %535 = vmatpush1.bf16.msra.mxu0 %v759_v45  ;;  %576 = vmatpush1.bf16.msra.mxu1 %v761_v46 }
  0x5f   :  { %536 = vmatprep.subr.bf16.mxu0 %v768_v47  ;;  %577 = vmatprep.subr.bf16.mxu1 %v770_v48 }
  0x60   :  { %566 = vmatprep.mubr.bf16.mxu0 %v927_v0  ;;  %607 = vmatprep.mubr.bf16.mxu1 %v927_v0 }
  0x62   :  { %537 = vmatpush1.bf16.msra.mxu0 %v767_v53  ;;  %578 = vmatpush1.bf16.msra.mxu1 %v769_v54 }
  0x63   :  { %538 = vmatprep.subr.bf16.mxu0 %v776_v55  ;;  %579 = vmatprep.subr.bf16.mxu1 %v778_v56 }
  0x66   :  { %539 = vmatpush1.bf16.msra.mxu0 %v775_v61  ;;  %580 = vmatpush1.bf16.msra.mxu1 %v777_v62 }
  0x67   :  { %540 = vmatprep.subr.bf16.mxu0 %v784_v63  ;;  %581 = vmatprep.subr.bf16.mxu1 %v786_v1 }
  0x6a   :  { %541 = vmatpush1.bf16.msra.mxu0 %v783_v6  ;;  %582 = vmatpush1.bf16.msra.mxu1 %v785_v8 }
  0x6b   :  { %616 = vmatprep.subr.bf16.mxu0 %v764_v9  ;;  %657 = vmatprep.subr.bf16.mxu1 %v766_v10 }
  0x6d   :  { %791 = vmatmul.mubr.msk.bf16.vlgmr.msra.gmra.mrb[8].mxu0 %vm530_vm1, %v73_v13  ;;  %792 = vmatmul.mubr.msk.bf16.vlgmr.msra.gmra.mrb[8].mxu1 %vm530_vm1, %v73_v13 }
  0x6e   :  { %617 = vmatpush1.bf16.msra.mxu0 %v763_v16  ;;  %658 = vmatpush1.bf16.msra.mxu1 %v765_v17 }
  0x6f   :  { %618 = vmatprep.subr.bf16.mxu0 %v772_v18  ;;  %659 = vmatprep.subr.bf16.mxu1 %v774_v19 }
  0x70   :  { %648 = vmatprep.mubr.bf16.mxu0 %v927_v0  ;;  %689 = vmatprep.mubr.bf16.mxu1 %v927_v0 }
  0x72   :  { %619 = vmatpush1.bf16.msra.mxu0 %v771_v24  ;;  %660 = vmatpush1.bf16.msra.mxu1 %v773_v25 }
  0x73   :  { %620 = vmatprep.subr.bf16.mxu0 %v780_v26  ;;  %661 = vmatprep.subr.bf16.mxu1 %v782_v27 }
  0x76   :  { %621 = vmatpush1.bf16.msra.mxu0 %v779_v32  ;;  %662 = vmatpush1.bf16.msra.mxu1 %v781_v33 }
  0x77   :  { %622 = vmatprep.subr.bf16.mxu0 %v788_v34  ;;  %663 = vmatprep.subr.bf16.mxu1 %v790_v35 }
  0x7a   :  { %623 = vmatpush1.bf16.msra.mxu0 %v787_v36  ;;  %664 = vmatpush1.bf16.msra.mxu1 %v789_v37 }
  0x7d   :  { %793 = vmatmul.mubr.msk.bf16.vlgmr.msra.gmra.mrb[12].mxu0 %vm530_vm1, %v73_v13  ;;  %794 = vmatmul.mubr.msk.bf16.vlgmr.msra.gmra.mrb[12].mxu1 %vm530_vm1, %v73_v13 }
 0x128   :  { %v208_v0 = vpop.f32.mrb[0].mxu0  ;;  %v249_v38 = vpop.f32.mrb[0].mxu1 }
 0x129   :  { %v210_v39 = vpop.f32.mrb[1].mxu0  ;;  %v251_v40 = vpop.f32.mrb[1].mxu1 }
 0x12a   :  { %v212_v41 = vpop.f32.mrb[2].mxu0  ;;  %v253_v42 = vpop.f32.mrb[2].mxu1 }
 0x12b   :  { %v213_v43 = vpop.f32.mrb[3].mxu0  ;;  %v254_v44 = vpop.f32.mrb[3].mxu1 }
 0x130   :  { %v290_v45 = vpop.f32.mrb[4].mxu0  ;;  %v331_v46 = vpop.f32.mrb[4].mxu1 }
 0x131   :  { %v292_v47 = vpop.f32.mrb[5].mxu0  ;;  %v333_v48 = vpop.f32.mrb[5].mxu1 }
 0x132   :  { %v294_v49 = vpop.f32.mrb[6].mxu0  ;;  %v335_v50 = vpop.f32.mrb[6].mxu1 }
 0x133   :  { %v295_v51 = vpop.f32.mrb[7].mxu0  ;;  %v336_v52 = vpop.f32.mrb[7].mxu1 }
 0x140   :  { %v568_v53 = vpop.f32.mrb[8].mxu0  ;;  %v609_v55 = vpop.f32.mrb[8].mxu1 }
 0x141   :  { %v698_v54 = vmul.f32 %v568_v53, %v208_v0  ;;  %v570_v56 = vpop.f32.mrb[9].mxu0  ;;  %v700_v57 = vmul.f32 %v609_v55, %v249_v38  ;;  %v611_v59 = vpop.f32.mrb[9].mxu1 }
 0x142   :  { %v699_v58 = vmul.f32 %v570_v56, %v210_v39  ;;  %v572_v60 = vpop.f32.mrb[10].mxu0  ;;  %v701_v62 = vmul.f32 %v611_v59, %v251_v40  ;;  %v613_v63 = vpop.f32.mrb[10].mxu1 }
 0x143   :  { %v706_v61 = vmul.f32 0.03125, %v698_v54  ;;  %v573_v1 = vpop.f32.mrb[11].mxu0  ;;  %v708_v2 = vmul.f32 0.03125, %v700_v57  ;;  %v614_v4 = vpop.f32.mrb[11].mxu1 }
 0x144   :  { %v707_v3 = vmul.f32 0.03125, %v699_v58  ;;  %v709_v5 = vmul.f32 0.03125, %v701_v62 }
 0x145   :  { %714 = vst [vmem:[#allocation10] sm:$0xff] %v706_v61  ;;  %716 = vst [vmem:[#allocation10 + $0x10] sm:$0xff] %v708_v2 }
 0x146   :  { %715 = vst [vmem:[#allocation10 + $0x8] sm:$0xff] %v707_v3  ;;  %717 = vst [vmem:[#allocation10 + $0x18] sm:$0xff] %v709_v5 }
 0x150   :  { %v650_v6 = vpop.f32.mrb[12].mxu0  ;;  %v691_v8 = vpop.f32.mrb[12].mxu1 }
 0x151   :  { %v702_v7 = vmul.f32 %v650_v6, %v290_v45  ;;  %v652_v9 = vpop.f32.mrb[13].mxu0  ;;  %v704_v10 = vmul.f32 %v691_v8, %v331_v46  ;;  %v693_v12 = vpop.f32.mrb[13].mxu1 }
 0x152   :  { %v703_v11 = vmul.f32 %v652_v9, %v292_v47  ;;  %v654_v13 = vpop.f32.mrb[14].mxu0  ;;  %v705_v15 = vmul.f32 %v693_v12, %v333_v48  ;;  %v695_v16 = vpop.f32.mrb[14].mxu1 }
 0x153   :  { %v710_v14 = vmul.f32 0.03125, %v702_v7  ;;  %v655_v17 = vpop.f32.mrb[15].mxu0  ;;  %v712_v18 = vmul.f32 0.03125, %v704_v10  ;;  %v696_v20 = vpop.f32.mrb[15].mxu1 }
 0x154   :  { %v711_v19 = vmul.f32 0.03125, %v703_v11  ;;  %v713_v21 = vmul.f32 0.03125, %v705_v15 }
 0x155   :  { %718 = vst [vmem:[#allocation10 + $0x20] sm:$0xff] %v710_v14  ;;  %720 = vst [vmem:[#allocation10 + $0x30] sm:$0xff] %v712_v18 }
 0x156   :  { %719 = vst [vmem:[#allocation10 + $0x28] sm:$0xff] %v711_v19  ;;  %721 = vst [vmem:[#allocation10 + $0x38] sm:$0xff] %v713_v21 }
 0x157   :  { %902 = shalt.err (!%p899_p8)
}
 0x158   :  { %s903_s1 = scalar_lea.hbm %s1040_s4, 1024 }
 0x159   :  { %p904_p9 = scmp.ne.s32.totalorder %s1040_s4, %s903_s1  ;;  %p907_p10 = scmp.lt.u32.totalorder %s903_s1, %s1040_s4 }
 0x15b   :  { %p909_p11 = pnand %p907_p10, %p904_p9 }
 0x15d   :  { %912 = shalt.err (!%p909_p11)
}
 0x15e   :  { %731 = dma.vmem_to_hbm [thread:$0]  %s729_s25, 1024, %s1040_s4, [#allocation4]  }
 0x15f   :  { %919 = dma.done.wait [#allocation4], 1024  }
 0x160   :  { %920 = vsyncadd [#allocation4], 4294966272 }
 0x161   :  { %735 = vsyncpa [#allocation3], 1 }
 0x162   :  { %736 = vsyncpa [#allocation6], 1 }
 0x163   :  { %737 = vsyncpa [#allocation9], 1 }
 0x164   :  { %738 = vsyncpa [#allocation4], 1 }

</bundles_post_ra>
